<compile_context>
chip_gen: v7x
topology: tpu7x:2x2x1
jax: 0.10.0
libtpu: 0.0.40
codegen_flags: <defaults>
</compile_context>

<pallas_src>
import functools

import jax
import jax.numpy as jnp
from jax.experimental import pallas as pl
from jax.experimental.pallas import tpu as pltpu


def _round_up(x: int, m: int) -> int:
    return ((x + m - 1) // m) * m


# --------------------------------------------------------------------------------------
# Pass 1: 3x3x3 sparse conv as one MXU contraction + per-channel sum/sumsq of y1.
# --------------------------------------------------------------------------------------
def _spatial_conv_stats_kernel(xg_ref, ws_ref, y1_ref, sum1_ref, sq1_ref):
    y1 = jnp.dot(xg_ref[...], ws_ref[...], preferred_element_type=jnp.float32)  # (tn, C)
    y1_ref[...] = y1

    @pl.when(pl.program_id(0) == 0)
    def _init():
        sum1_ref[...] = jnp.zeros_like(sum1_ref)
        sq1_ref[...] = jnp.zeros_like(sq1_ref)

    sum1_ref[...] += jnp.sum(y1, axis=0, keepdims=True)
    sq1_ref[...] += jnp.sum(y1 * y1, axis=0, keepdims=True)


# --------------------------------------------------------------------------------------
# Pass 2: BN1 + sigmoid + gated residual -> f1; 1x1x1 conv; per-channel sum/sumsq of y2.
# --------------------------------------------------------------------------------------
def _branch1_apply_conv2_kernel(f_ref, y1_ref, sum1_ref, sq1_ref, wp_ref, gs_ref, bs_ref,
                                f1_ref, sum2_ref, sq2_ref, *, inv_n: float, eps: float):
    mean1 = sum1_ref[...] * inv_n                                   # (1, C)
    var1 = jnp.maximum(sq1_ref[...] * inv_n - mean1 * mean1, 0.0)   # biased variance
    scale1 = jax.lax.rsqrt(var1 + eps) * gs_ref[...]
    s1 = jax.nn.sigmoid((y1_ref[...] - mean1) * scale1 + bs_ref[...])
    f1 = f_ref[...] * (1.0 + s1)                                    # x + x * score
    f1_ref[...] = f1

    y2 = jnp.dot(f1, wp_ref[...], preferred_element_type=jnp.float32)  # f32 1x1 conv

    @pl.when(pl.program_id(0) == 0)
    def _init():
        sum2_ref[...] = jnp.zeros_like(sum2_ref)
        sq2_ref[...] = jnp.zeros_like(sq2_ref)

    sum2_ref[...] += jnp.sum(y2, axis=0, keepdims=True)
    sq2_ref[...] += jnp.sum(y2 * y2, axis=0, keepdims=True)


# --------------------------------------------------------------------------------------
# Pass 3: BN2 + sigmoid + gated residual (y2 recomputed from f1; cheaper than HBM round trip).
# --------------------------------------------------------------------------------------
def _branch2_apply_kernel(f1_ref, sum2_ref, sq2_ref, wp_ref, gc_ref, bc_ref, out_ref,
                          *, inv_n: float, eps: float):
    f1 = f1_ref[...]
    y2 = jnp.dot(f1, wp_ref[...], preferred_element_type=jnp.float32)
    mean2 = sum2_ref[...] * inv_n
    var2 = jnp.maximum(sq2_ref[...] * inv_n - mean2 * mean2, 0.0)
    scale2 = jax.lax.rsqrt(var2 + eps) * gc_ref[...]
    s2 = jax.nn.sigmoid((y2 - mean2) * scale2 + bc_ref[...])
    out_ref[...] = f1 * (1.0 + s2)


# --------------------------------------------------------------------------------------
# Host-side glue: kernel map for a 3x3x3 sparse conv (O(K*N*log N) sorted-key search).
# --------------------------------------------------------------------------------------
def build_kernel_map(coords):
    """For each of the 27 offsets and each point: neighbor row index + validity mask.

    coords: (N, 3) int32 unique voxel coordinates (may be negative).
    Returns idx (27, N) int32 and valid (27, N) bool.
    Note: int32 keys assume per-axis coordinate range < ~1200 (base^3 < 2^31).
    """
    coords = coords.astype(jnp.int32)
    n = coords.shape[0]
    r = jnp.arange(-1, 2)
    offs = jnp.stack(jnp.meshgrid(r, r, r, indexing="ij"), axis=-1).reshape(-1, 3)  # (27,3)

    # Shift so every digit (coord + offset) is >= 0 even for negative voxel coordinates.
    cmin = jnp.min(coords, axis=0)
    shifted = coords - cmin[None, :] + 1            # every axis value >= 1
    base = jnp.max(shifted) + 2                     # digit + offset in [0, base-1]

    def encode(c):                                  # collision-free integer key
        return (c[..., 0] * base + c[..., 1]) * base + c[..., 2]

    keys = encode(shifted)                          # (N,)
    order = jnp.argsort(keys)
    sorted_keys = keys[order]

    tgt = encode(shifted[None, :, :] + offs[:, None, :]).reshape(-1)   # (27*N,)
    pos = jnp.clip(jnp.searchsorted(sorted_keys, tgt), 0, n - 1)
    valid = (sorted_keys[pos] == tgt).reshape(27, n)
    idx = order[pos].reshape(27, n)
    return idx, valid


# --------------------------------------------------------------------------------------
# Wrapper: full AttentionBlock forward on sparse features.
# --------------------------------------------------------------------------------------
def attention_block(feats, coords, w_spatial, gamma_s, beta_s,
                    w_point, gamma_c, beta_c, *, eps: float = 1e-5, tile_n: int = 2048):
    """
      feats     : (N, C) f32      sparse-tensor features (row = point, col = channel)
      coords    : (N, 3) int32    unique voxel coordinates
      w_spatial : (27, C, C) f32  3x3x3 conv weight (torchsparse layout: (K^3, Cin, Cout))
      w_point   : (C, C)  f32     1x1x1 conv weight
      gamma/beta: (C,)    f32     BN affine parameters for each branch
      tile_n    : points per grid step (use ~2048-4096 on v7x, up to ~8192 on v5e/v6e)
    """
    feats = feats.astype(jnp.float32)
    N, C = feats.shape
    K = w_spatial.shape[0]
    KC = K * C

    # ---- kernel map + neighbor gather, built directly in (N, K*C) order (no transpose) ----
    idx, valid = build_kernel_map(coords)                               # (K, N)
    xg = jnp.where(valid.T[..., None], feats[idx.T], 0.0)               # (N, K, C)
    xg = xg.reshape(N, KC).astype(jnp.bfloat16)                         # bf16 slab, unpadded

    ws = w_spatial.astype(jnp.bfloat16).reshape(KC, C)                  # (K*C, C) bf16
    wp = w_point.reshape(C, C).astype(jnp.float32)                      # f32 (tiny)
    gs = gamma_s.reshape(1, C).astype(jnp.float32)
    bs = beta_s.reshape(1, C).astype(jnp.float32)
    gc = gamma_c.reshape(1, C).astype(jnp.float32)
    bc = beta_c.reshape(1, C).astype(jnp.float32)

    # ---- N-axis tiling (zero-padded rows are inert for the BN sums) ----
    tile_n = max(8, min(_round_up(tile_n, 8), _round_up(N, 8)))
    n_pad = _round_up(N, tile_n)
    num_tiles = n_pad // tile_n
    if n_pad != N:
        xg = jnp.pad(xg, ((0, n_pad - N), (0, 0)))
        feats_p = jnp.pad(feats, ((0, n_pad - N), (0, 0)))
    else:
        feats_p = feats

    inv_n = 1.0 / float(N)   # BN statistics divide by the TRUE point count

    tile_spec = lambda: pl.BlockSpec((tile_n, C), lambda i: (i, 0))
    full = lambda shape: pl.BlockSpec(shape, lambda i: (0, 0))
    vmem_limit = 32 * 1024 * 1024
    cp_reduce = pltpu.CompilerParams(dimension_semantics=("arbitrary",),
                                     vmem_limit_bytes=vmem_limit)
    cp_parallel = pltpu.CompilerParams(dimension_semantics=("parallel",),
                                       vmem_limit_bytes=vmem_limit)

    # ---- pass 1: sparse 3x3x3 conv (one MXU contraction) + sum/sumsq of y1 ----
    y1, sum1, sq1 = pl.pallas_call(
        _spatial_conv_stats_kernel,
        grid=(num_tiles,),
        in_specs=[pl.BlockSpec((tile_n, KC), lambda i: (i, 0)), full((KC, C))],
        out_specs=(tile_spec(), full((1, C)), full((1, C))),
        out_shape=(jax.ShapeDtypeStruct((n_pad, C), jnp.float32),
                   jax.ShapeDtypeStruct((1, C), jnp.float32),
                   jax.ShapeDtypeStruct((1, C), jnp.float32)),
        compiler_params=cp_reduce,
        cost_estimate=pl.CostEstimate(
            flops=2 * n_pad * KC * C,
            transcendentals=0,
            bytes_accessed=n_pad * KC * 2 + KC * C * 2 + n_pad * C * 4 + 2 * C * 4),
    )(xg, ws)

    # ---- pass 2: BN1 + sigmoid + gated residual; 1x1x1 conv; sum/sumsq of y2 ----
    f1, sum2, sq2 = pl.pallas_call(
        functools.partial(_branch1_apply_conv2_kernel, inv_n=inv_n, eps=eps),
        grid=(num_tiles,),
        in_specs=[tile_spec(), tile_spec(), full((1, C)), full((1, C)),
                  full((C, C)), full((1, C)), full((1, C))],
        out_specs=(tile_spec(), full((1, C)), full((1, C))),
        out_shape=(jax.ShapeDtypeStruct((n_pad, C), jnp.float32),
                   jax.ShapeDtypeStruct((1, C), jnp.float32),
                   jax.ShapeDtypeStruct((1, C), jnp.float32)),
        input_output_aliases={0: 0},            # feats buffer reused for f1
        compiler_params=cp_reduce,
        cost_estimate=pl.CostEstimate(
            flops=2 * n_pad * C * C + 12 * n_pad * C,
            transcendentals=n_pad * C,
            bytes_accessed=3 * n_pad * C * 4 + (C * C + 6 * C) * 4),
    )(feats_p, y1, sum1, sq1, wp, gs, bs)

    # ---- pass 3: BN2 + sigmoid + gated residual (recomputes the tiny 1x1 matmul) ----
    out = pl.pallas_call(
        functools.partial(_branch2_apply_kernel, inv_n=inv_n, eps=eps),
        grid=(num_tiles,),
        in_specs=[tile_spec(), full((1, C)), full((1, C)),
                  full((C, C)), full((1, C)), full((1, C))],
        out_specs=tile_spec(),
        out_shape=jax.ShapeDtypeStruct((n_pad, C), jnp.float32),
        input_output_aliases={0: 0},            # f1 buffer reused for the output
        compiler_params=cp_parallel,
        cost_estimate=pl.CostEstimate(
            flops=2 * n_pad * C * C + 12 * n_pad * C,
            transcendentals=n_pad * C,
            bytes_accessed=2 * n_pad * C * 4 + (C * C + 6 * C) * 4),
    )(f1, sum2, sq2, wp, gc, bc)

    return out[:N]


if __name__ == "__main__":
    key = jax.random.PRNGKey(0)
    k_coord, k_feat, k_w3, k_w1 = jax.random.split(key, 4)

    dim = 16   # channel dim of the AttentionBlock
    N = 60     # number of active sparse points (deliberately not a multiple of tile_n)

    # Deterministic unique voxel coordinates: N cells of a 5x5x5 grid, centered so that
    # negative coordinates exercise the fixed kernel-map encoding.
    g = jnp.arange(5)
    grid_pts = jnp.stack(jnp.meshgrid(g, g, g, indexing="ij"), axis=-1).reshape(-1, 3)
    perm = jax.random.permutation(k_coord, grid_pts.shape[0])[:N]
    coords = (grid_pts[perm] - 2).astype(jnp.int32)                     # (N, 3), in [-2, 2]

    feats = jax.random.normal(k_feat, (N, dim), dtype=jnp.float32)      # x.F

    # Parameters (synthetic init; spnn.Conv3d has no bias, BN defaults gamma=1, beta=0).
    w_spatial = 0.1 * jax.random.normal(k_w3, (27, dim, dim), dtype=jnp.float32)
    w_point = 0.1 * jax.random.normal(k_w1, (dim, dim), dtype=jnp.float32)
    gamma_s = jnp.ones((dim,), jnp.float32)
    beta_s = jnp.zeros((dim,), jnp.float32)
    gamma_c = jnp.ones((dim,), jnp.float32)
    beta_c = jnp.zeros((dim,), jnp.float32)

    # tile_n=16 so the toy problem actually exercises the multi-tile BN accumulation path.
    fn = jax.jit(functools.partial(attention_block, eps=1e-5, tile_n=16))
    out = fn(feats, coords, w_spatial, gamma_s, beta_s, w_point, gamma_c, beta_c)
    jax.block_until_ready(out)
    assert out.shape == (N, dim) and out.dtype == jnp.float32

    # Pure-JAX f32 reference (kernel's first matmul is bf16 -> loose-ish tolerance).
    def reference(eps=1e-5):
        idx, valid = build_kernel_map(coords)
        xg = jnp.where(valid.T[..., None], feats[idx.T], 0.0)          # (N, 27, C)
        y1 = jnp.einsum("nkc,kco->no", xg, w_spatial,
                        precision=jax.lax.Precision.HIGHEST)

        def bn_sig(y, gamma, beta):
            m = jnp.mean(y, axis=0, keepdims=True)
            v = jnp.mean((y - m) ** 2, axis=0, keepdims=True)
            return jax.nn.sigmoid((y - m) * jax.lax.rsqrt(v + eps) * gamma + beta)

        f1 = feats + feats * bn_sig(y1, gamma_s, beta_s)
        y2 = jnp.dot(f1, w_point, precision=jax.lax.Precision.HIGHEST)
        return f1 + f1 * bn_sig(y2, gamma_c, beta_c)

    ref = reference()
    max_err = float(jnp.max(jnp.abs(out - ref)))
    assert max_err < 5e-2, f"max abs error vs f32 reference: {max_err}"
    print("KERNEL_OK")
</pallas_src>

<mosaic_0001>
module attributes {stable_mosaic.version = 11 : i64} {
  func.func @_spatial_conv_stats_kernel(%arg0: i32, %arg1: memref<16x432xbf16, #tpu.memory_space<vmem>>, %arg2: memref<432x16xbf16, #tpu.memory_space<vmem>>, %arg3: memref<16x16xf32, #tpu.memory_space<vmem>>, %arg4: memref<1x16xf32, #tpu.memory_space<vmem>>, %arg5: memref<1x16xf32, #tpu.memory_space<vmem>>) attributes {dimension_semantics = [#tpu.dimension_semantics<arbitrary>], iteration_bounds = array<i64: 4>, scalar_prefetch = 0 : i64, scratch_operands = 0 : i64, tpu.core_type = #tpu.core_type<tc>, window_params = [{transform_indices = @transform_0, window_bounds = array<i64: 16, 432>}, {pipeline_mode = #tpu.pipeline_mode<synchronous>, transform_indices = @transform_1, window_bounds = array<i64: 432, 16>}, {transform_indices = @transform_2, window_bounds = array<i64: 16, 16>}, {pipeline_mode = #tpu.pipeline_mode<synchronous>, transform_indices = @transform_3, window_bounds = array<i64: 1, 16>}, {pipeline_mode = #tpu.pipeline_mode<synchronous>, transform_indices = @transform_4, window_bounds = array<i64: 1, 16>}]} {
    %c0 = arith.constant 0 : index
    %c0_0 = arith.constant 0 : index
    %0 = vector.load %arg1[%c0, %c0_0] : memref<16x432xbf16, #tpu.memory_space<vmem>>, vector<16x432xbf16>
    %c0_1 = arith.constant 0 : index
    %c0_2 = arith.constant 0 : index
    %1 = vector.load %arg2[%c0_1, %c0_2] : memref<432x16xbf16, #tpu.memory_space<vmem>>, vector<432x16xbf16>
    %cst = arith.constant dense<0.000000e+00> : vector<16x16xf32>
    %2 = tpu.matmul %0, %1, %cst {dimension_numbers = #tpu.dot_dimension_numbers<[1], [0], [0], [1], [0, 0, 1, 1], [], []>} : vector<16x432xbf16>, vector<432x16xbf16>, vector<16x16xf32> -> vector<16x16xf32>
    %c0_3 = arith.constant 0 : index
    %c0_4 = arith.constant 0 : index
    %3 = vector.load %arg3[%c0_3, %c0_4] : memref<16x16xf32, #tpu.memory_space<vmem>>, vector<16x16xf32>
    tpu.vector_store %arg3[%c0_3, %c0_4], %2 {strides = array<i32>} : memref<16x16xf32, #tpu.memory_space<vmem>>, vector<16x16xf32>,
    %c0_i32 = arith.constant 0 : i32
    %4 = arith.cmpi eq, %arg0, %c0_i32 : i32
    %5 = arith.extui %4 : i1 to i32
    %c0_i32_5 = arith.constant 0 : i32
    %6 = arith.cmpi ne, %5, %c0_i32_5 : i32
    scf.if %6 {
      %cst_16 = arith.constant 0.000000e+00 : f32
      %18 = vector.broadcast %cst_16 : f32 to vector<1x16xf32>
      %c0_17 = arith.constant 0 : index
      %c0_18 = arith.constant 0 : index
      %19 = vector.load %arg4[%c0_17, %c0_18] : memref<1x16xf32, #tpu.memory_space<vmem>>, vector<1x16xf32>
      tpu.vector_store %arg4[%c0_17, %c0_18], %18 {strides = array<i32>} : memref<1x16xf32, #tpu.memory_space<vmem>>, vector<1x16xf32>,
      %cst_19 = arith.constant 0.000000e+00 : f32
      %20 = vector.broadcast %cst_19 : f32 to vector<1x16xf32>
      %c0_20 = arith.constant 0 : index
      %c0_21 = arith.constant 0 : index
      %21 = vector.load %arg5[%c0_20, %c0_21] : memref<1x16xf32, #tpu.memory_space<vmem>>, vector<1x16xf32>
      tpu.vector_store %arg5[%c0_20, %c0_21], %20 {strides = array<i32>} : memref<1x16xf32, #tpu.memory_space<vmem>>, vector<1x16xf32>,
    } else {
    }
    %c0_6 = arith.constant 0 : index
    %c0_7 = arith.constant 0 : index
    %7 = vector.load %arg4[%c0_6, %c0_7] : memref<1x16xf32, #tpu.memory_space<vmem>>, vector<1x16xf32>
    %cst_8 = arith.constant dense<0.000000e+00> : vector<16xf32>
    %8 = vector.multi_reduction <add>, %2, %cst_8 [0] : vector<16x16xf32> to vector<16xf32>
    %9 = vector.shape_cast %8 : vector<16xf32> to vector<1x16xf32>
    %10 = arith.addf %7, %9 : vector<1x16xf32>
    %c0_9 = arith.constant 0 : index
    %c0_10 = arith.constant 0 : index
    %11 = vector.load %arg4[%c0_9, %c0_10] : memref<1x16xf32, #tpu.memory_space<vmem>>, vector<1x16xf32>
    tpu.vector_store %arg4[%c0_9, %c0_10], %10 {strides = array<i32>} : memref<1x16xf32, #tpu.memory_space<vmem>>, vector<1x16xf32>,
    %c0_11 = arith.constant 0 : index
    %c0_12 = arith.constant 0 : index
    %12 = vector.load %arg5[%c0_11, %c0_12] : memref<1x16xf32, #tpu.memory_space<vmem>>, vector<1x16xf32>
    %13 = arith.mulf %2, %2 : vector<16x16xf32>
    %cst_13 = arith.constant dense<0.000000e+00> : vector<16xf32>
    %14 = vector.multi_reduction <add>, %13, %cst_13 [0] : vector<16x16xf32> to vector<16xf32>
    %15 = vector.shape_cast %14 : vector<16xf32> to vector<1x16xf32>
    %16 = arith.addf %12, %15 : vector<1x16xf32>
    %c0_14 = arith.constant 0 : index
    %c0_15 = arith.constant 0 : index
    %17 = vector.load %arg5[%c0_14, %c0_15] : memref<1x16xf32, #tpu.memory_space<vmem>>, vector<1x16xf32>
    tpu.vector_store %arg5[%c0_14, %c0_15], %16 {strides = array<i32>} : memref<1x16xf32, #tpu.memory_space<vmem>>, vector<1x16xf32>,
    return
  }
  func.func @transform_0(%arg0: i32) -> (i32, i32) {
    %c0_i32 = arith.constant 0 : i32
    %c0_i32_0 = arith.constant 0 : i32
    return %arg0, %c0_i32 : i32, i32
  }
  func.func @transform_1(%arg0: i32) -> (i32, i32) {
    %c0_i32 = arith.constant 0 : i32
    %c0_i32_0 = arith.constant 0 : i32
    %c0_i32_1 = arith.constant 0 : i32
    return %c0_i32, %c0_i32_0 : i32, i32
  }
  func.func @transform_2(%arg0: i32) -> (i32, i32) {
    %c0_i32 = arith.constant 0 : i32
    %c0_i32_0 = arith.constant 0 : i32
    return %arg0, %c0_i32 : i32, i32
  }
  func.func @transform_3(%arg0: i32) -> (i32, i32) {
    %c0_i32 = arith.constant 0 : i32
    %c0_i32_0 = arith.constant 0 : i32
    %c0_i32_1 = arith.constant 0 : i32
    return %c0_i32, %c0_i32_0 : i32, i32
  }
  func.func @transform_4(%arg0: i32) -> (i32, i32) {
    %c0_i32 = arith.constant 0 : i32
    %c0_i32_0 = arith.constant 0 : i32
    %c0_i32_1 = arith.constant 0 : i32
    return %c0_i32, %c0_i32_0 : i32, i32
  }
}

module attributes {stable_mosaic.version = 11 : i64} {
  func.func @_branch1_apply_conv2_kernel(%arg0: i32, %arg1: memref<16x16xf32, #tpu.memory_space<vmem>>, %arg2: memref<16x16xf32, #tpu.memory_space<vmem>>, %arg3: memref<1x16xf32, #tpu.memory_space<vmem>>, %arg4: memref<1x16xf32, #tpu.memory_space<vmem>>, %arg5: memref<16x16xf32, #tpu.memory_space<vmem>>, %arg6: memref<1x16xf32, #tpu.memory_space<vmem>>, %arg7: memref<1x16xf32, #tpu.memory_space<vmem>>, %arg8: memref<16x16xf32, #tpu.memory_space<vmem>>, %arg9: memref<1x16xf32, #tpu.memory_space<vmem>>, %arg10: memref<1x16xf32, #tpu.memory_space<vmem>>) attributes {dimension_semantics = [#tpu.dimension_semantics<arbitrary>], iteration_bounds = array<i64: 4>, scalar_prefetch = 0 : i64, scratch_operands = 0 : i64, tpu.core_type = #tpu.core_type<tc>, window_params = [{transform_indices = @transform_0, window_bounds = array<i64: 16, 16>}, {transform_indices = @transform_1, window_bounds = array<i64: 16, 16>}, {pipeline_mode = #tpu.pipeline_mode<synchronous>, transform_indices = @transform_2, window_bounds = array<i64: 1, 16>}, {pipeline_mode = #tpu.pipeline_mode<synchronous>, transform_indices = @transform_3, window_bounds = array<i64: 1, 16>}, {pipeline_mode = #tpu.pipeline_mode<synchronous>, transform_indices = @transform_4, window_bounds = array<i64: 16, 16>}, {pipeline_mode = #tpu.pipeline_mode<synchronous>, transform_indices = @transform_5, window_bounds = array<i64: 1, 16>}, {pipeline_mode = #tpu.pipeline_mode<synchronous>, transform_indices = @transform_6, window_bounds = array<i64: 1, 16>}, {transform_indices = @transform_7, window_bounds = array<i64: 16, 16>}, {pipeline_mode = #tpu.pipeline_mode<synchronous>, transform_indices = @transform_8, window_bounds = array<i64: 1, 16>}, {pipeline_mode = #tpu.pipeline_mode<synchronous>, transform_indices = @transform_9, window_bounds = array<i64: 1, 16>}]} {
    %c0 = arith.constant 0 : index
    %c0_0 = arith.constant 0 : index
    %0 = vector.load %arg3[%c0, %c0_0] : memref<1x16xf32, #tpu.memory_space<vmem>>, vector<1x16xf32>
    %cst = arith.constant 0.0166666675 : f32
    %1 = vector.broadcast %cst : f32 to vector<1x16xf32>
    %2 = arith.mulf %0, %1 : vector<1x16xf32>
    %c0_1 = arith.constant 0 : index
    %c0_2 = arith.constant 0 : index
    %3 = vector.load %arg4[%c0_1, %c0_2] : memref<1x16xf32, #tpu.memory_space<vmem>>, vector<1x16xf32>
    %cst_3 = arith.constant 0.0166666675 : f32
    %4 = vector.broadcast %cst_3 : f32 to vector<1x16xf32>
    %5 = arith.mulf %3, %4 : vector<1x16xf32>
    %6 = arith.mulf %2, %2 : vector<1x16xf32>
    %7 = arith.subf %5, %6 : vector<1x16xf32>
    %cst_4 = arith.constant 0.000000e+00 : f32
    %8 = vector.broadcast %cst_4 : f32 to vector<1x16xf32>
    %9 = arith.maximumf %7, %8 : vector<1x16xf32>
    %cst_5 = arith.constant 9.99999974E-6 : f32
    %10 = vector.broadcast %cst_5 : f32 to vector<1x16xf32>
    %11 = arith.addf %9, %10 : vector<1x16xf32>
    %12 = math.rsqrt %11 : vector<1x16xf32>
    %c0_6 = arith.constant 0 : index
    %c0_7 = arith.constant 0 : index
    %13 = vector.load %arg6[%c0_6, %c0_7] : memref<1x16xf32, #tpu.memory_space<vmem>>, vector<1x16xf32>
    %14 = arith.mulf %12, %13 : vector<1x16xf32>
    %c0_8 = arith.constant 0 : index
    %c0_9 = arith.constant 0 : index
    %15 = vector.load %arg2[%c0_8, %c0_9] : memref<16x16xf32, #tpu.memory_space<vmem>>, vector<16x16xf32>
    %16 = vector.broadcast %2 : vector<1x16xf32> to vector<16x16xf32>
    %17 = arith.subf %15, %16 : vector<16x16xf32>
    %18 = vector.broadcast %14 : vector<1x16xf32> to vector<16x16xf32>
    %19 = arith.mulf %17, %18 : vector<16x16xf32>
    %c0_10 = arith.constant 0 : index
    %c0_11 = arith.constant 0 : index
    %20 = vector.load %arg7[%c0_10, %c0_11] : memref<1x16xf32, #tpu.memory_space<vmem>>, vector<1x16xf32>
    %21 = vector.broadcast %20 : vector<1x16xf32> to vector<16x16xf32>
    %22 = arith.addf %19, %21 : vector<16x16xf32>
    %23 = arith.negf %22 : vector<16x16xf32>
    %24 = math.exp %23 : vector<16x16xf32>
    %cst_12 = arith.constant 1.000000e+00 : f32
    %25 = vector.broadcast %cst_12 : f32 to vector<16x16xf32>
    %26 = arith.addf %25, %24 : vector<16x16xf32>
    %27 = arith.divf %25, %26 : vector<16x16xf32>
    %c0_13 = arith.constant 0 : index
    %c0_14 = arith.constant 0 : index
    %28 = vector.load %arg1[%c0_13, %c0_14] : memref<16x16xf32, #tpu.memory_space<vmem>>, vector<16x16xf32>
    %cst_15 = arith.constant 1.000000e+00 : f32
    %29 = vector.broadcast %cst_15 : f32 to vector<16x16xf32>
    %30 = arith.addf %29, %27 : vector<16x16xf32>
    %31 = arith.mulf %28, %30 : vector<16x16xf32>
    %c0_16 = arith.constant 0 : index
    %c0_17 = arith.constant 0 : index
    %32 = vector.load %arg8[%c0_16, %c0_17] : memref<16x16xf32, #tpu.memory_space<vmem>>, vector<16x16xf32>
    tpu.vector_store %arg8[%c0_16, %c0_17], %31 {strides = array<i32>} : memref<16x16xf32, #tpu.memory_space<vmem>>, vector<16x16xf32>,
    %c0_18 = arith.constant 0 : index
    %c0_19 = arith.constant 0 : index
    %33 = vector.load %arg5[%c0_18, %c0_19] : memref<16x16xf32, #tpu.memory_space<vmem>>, vector<16x16xf32>
    %cst_20 = arith.constant dense<0.000000e+00> : vector<16x16xf32>
    %34 = tpu.matmul %31, %33, %cst_20 {dimension_numbers = #tpu.dot_dimension_numbers<[1], [0], [0], [1], [0, 0, 1, 1], [], []>} : vector<16x16xf32>, vector<16x16xf32>, vector<16x16xf32> -> vector<16x16xf32>
    %c0_i32 = arith.constant 0 : i32
    %35 = arith.cmpi eq, %arg0, %c0_i32 : i32
    %36 = arith.extui %35 : i1 to i32
    %c0_i32_21 = arith.constant 0 : i32
    %37 = arith.cmpi ne, %36, %c0_i32_21 : i32
    scf.if %37 {
      %cst_32 = arith.constant 0.000000e+00 : f32
      %49 = vector.broadcast %cst_32 : f32 to vector<1x16xf32>
      %c0_33 = arith.constant 0 : index
      %c0_34 = arith.constant 0 : index
      %50 = vector.load %arg9[%c0_33, %c0_34] : memref<1x16xf32, #tpu.memory_space<vmem>>, vector<1x16xf32>
      tpu.vector_store %arg9[%c0_33, %c0_34], %49 {strides = array<i32>} : memref<1x16xf32, #tpu.memory_space<vmem>>, vector<1x16xf32>,
      %cst_35 = arith.constant 0.000000e+00 : f32
      %51 = vector.broadcast %cst_35 : f32 to vector<1x16xf32>
      %c0_36 = arith.constant 0 : index
      %c0_37 = arith.constant 0 : index
      %52 = vector.load %arg10[%c0_36, %c0_37] : memref<1x16xf32, #tpu.memory_space<vmem>>, vector<1x16xf32>
      tpu.vector_store %arg10[%c0_36, %c0_37], %51 {strides = array<i32>} : memref<1x16xf32, #tpu.memory_space<vmem>>, vector<1x16xf32>,
    } else {
    }
    %c0_22 = arith.constant 0 : index
    %c0_23 = arith.constant 0 : index
    %38 = vector.load %arg9[%c0_22, %c0_23] : memref<1x16xf32, #tpu.memory_space<vmem>>, vector<1x16xf32>
    %cst_24 = arith.constant dense<0.000000e+00> : vector<16xf32>
    %39 = vector.multi_reduction <add>, %34, %cst_24 [0] : vector<16x16xf32> to vector<16xf32>
    %40 = vector.shape_cast %39 : vector<16xf32> to vector<1x16xf32>
    %41 = arith.addf %38, %40 : vector<1x16xf32>
    %c0_25 = arith.constant 0 : index
    %c0_26 = arith.constant 0 : index
    %42 = vector.load %arg9[%c0_25, %c0_26] : memref<1x16xf32, #tpu.memory_space<vmem>>, vector<1x16xf32>
    tpu.vector_store %arg9[%c0_25, %c0_26], %41 {strides = array<i32>} : memref<1x16xf32, #tpu.memory_space<vmem>>, vector<1x16xf32>,
    %c0_27 = arith.constant 0 : index
    %c0_28 = arith.constant 0 : index
    %43 = vector.load %arg10[%c0_27, %c0_28] : memref<1x16xf32, #tpu.memory_space<vmem>>, vector<1x16xf32>
    %44 = arith.mulf %34, %34 : vector<16x16xf32>
    %cst_29 = arith.constant dense<0.000000e+00> : vector<16xf32>
    %45 = vector.multi_reduction <add>, %44, %cst_29 [0] : vector<16x16xf32> to vector<16xf32>
    %46 = vector.shape_cast %45 : vector<16xf32> to vector<1x16xf32>
    %47 = arith.addf %43, %46 : vector<1x16xf32>
    %c0_30 = arith.constant 0 : index
    %c0_31 = arith.constant 0 : index
    %48 = vector.load %arg10[%c0_30, %c0_31] : memref<1x16xf32, #tpu.memory_space<vmem>>, vector<1x16xf32>
    tpu.vector_store %arg10[%c0_30, %c0_31], %47 {strides = array<i32>} : memref<1x16xf32, #tpu.memory_space<vmem>>, vector<1x16xf32>,
    return
  }
  func.func @transform_0(%arg0: i32) -> (i32, i32) {
    %c0_i32 = arith.constant 0 : i32
    %c0_i32_0 = arith.constant 0 : i32
    return %arg0, %c0_i32 : i32, i32
  }
  func.func @transform_1(%arg0: i32) -> (i32, i32) {
    %c0_i32 = arith.constant 0 : i32
    %c0_i32_0 = arith.constant 0 : i32
    return %arg0, %c0_i32 : i32, i32
  }
  func.func @transform_2(%arg0: i32) -> (i32, i32) {
    %c0_i32 = arith.constant 0 : i32
    %c0_i32_0 = arith.constant 0 : i32
    %c0_i32_1 = arith.constant 0 : i32
    return %c0_i32, %c0_i32_0 : i32, i32
  }
  func.func @transform_3(%arg0: i32) -> (i32, i32) {
    %c0_i32 = arith.constant 0 : i32
    %c0_i32_0 = arith.constant 0 : i32
    %c0_i32_1 = arith.constant 0 : i32
    return %c0_i32, %c0_i32_0 : i32, i32
  }
  func.func @transform_4(%arg0: i32) -> (i32, i32) {
    %c0_i32 = arith.constant 0 : i32
    %c0_i32_0 = arith.constant 0 : i32
    %c0_i32_1 = arith.constant 0 : i32
    return %c0_i32, %c0_i32_0 : i32, i32
  }
  func.func @transform_5(%arg0: i32) -> (i32, i32) {
    %c0_i32 = arith.constant 0 : i32
    %c0_i32_0 = arith.constant 0 : i32
    %c0_i32_1 = arith.constant 0 : i32
    return %c0_i32, %c0_i32_0 : i32, i32
  }
  func.func @transform_6(%arg0: i32) -> (i32, i32) {
    %c0_i32 = arith.constant 0 : i32
    %c0_i32_0 = arith.constant 0 : i32
    %c0_i32_1 = arith.constant 0 : i32
    return %c0_i32, %c0_i32_0 : i32, i32
  }
  func.func @transform_7(%arg0: i32) -> (i32, i32) {
    %c0_i32 = arith.constant 0 : i32
    %c0_i32_0 = arith.constant 0 : i32
    return %arg0, %c0_i32 : i32, i32
  }
  func.func @transform_8(%arg0: i32) -> (i32, i32) {
    %c0_i32 = arith.constant 0 : i32
    %c0_i32_0 = arith.constant 0 : i32
    %c0_i32_1 = arith.constant 0 : i32
    return %c0_i32, %c0_i32_0 : i32, i32
  }
  func.func @transform_9(%arg0: i32) -> (i32, i32) {
    %c0_i32 = arith.constant 0 : i32
    %c0_i32_0 = arith.constant 0 : i32
    %c0_i32_1 = arith.constant 0 : i32
    return %c0_i32, %c0_i32_0 : i32, i32
  }
}

module attributes {stable_mosaic.version = 11 : i64} {
  func.func @_branch2_apply_kernel(%arg0: i32, %arg1: memref<16x16xf32, #tpu.memory_space<vmem>>, %arg2: memref<1x16xf32, #tpu.memory_space<vmem>>, %arg3: memref<1x16xf32, #tpu.memory_space<vmem>>, %arg4: memref<16x16xf32, #tpu.memory_space<vmem>>, %arg5: memref<1x16xf32, #tpu.memory_space<vmem>>, %arg6: memref<1x16xf32, #tpu.memory_space<vmem>>, %arg7: memref<16x16xf32, #tpu.memory_space<vmem>>) attributes {dimension_semantics = [#tpu.dimension_semantics<parallel>], iteration_bounds = array<i64: 4>, scalar_prefetch = 0 : i64, scratch_operands = 0 : i64, tpu.core_type = #tpu.core_type<tc>, window_params = [{transform_indices = @transform_0, window_bounds = array<i64: 16, 16>}, {pipeline_mode = #tpu.pipeline_mode<synchronous>, transform_indices = @transform_1, window_bounds = array<i64: 1, 16>}, {pipeline_mode = #tpu.pipeline_mode<synchronous>, transform_indices = @transform_2, window_bounds = array<i64: 1, 16>}, {pipeline_mode = #tpu.pipeline_mode<synchronous>, transform_indices = @transform_3, window_bounds = array<i64: 16, 16>}, {pipeline_mode = #tpu.pipeline_mode<synchronous>, transform_indices = @transform_4, window_bounds = array<i64: 1, 16>}, {pipeline_mode = #tpu.pipeline_mode<synchronous>, transform_indices = @transform_5, window_bounds = array<i64: 1, 16>}, {transform_indices = @transform_6, window_bounds = array<i64: 16, 16>}]} {
    %c0 = arith.constant 0 : index
    %c0_0 = arith.constant 0 : index
    %0 = vector.load %arg1[%c0, %c0_0] : memref<16x16xf32, #tpu.memory_space<vmem>>, vector<16x16xf32>
    %c0_1 = arith.constant 0 : index
    %c0_2 = arith.constant 0 : index
    %1 = vector.load %arg4[%c0_1, %c0_2] : memref<16x16xf32, #tpu.memory_space<vmem>>, vector<16x16xf32>
    %cst = arith.constant dense<0.000000e+00> : vector<16x16xf32>
    %2 = tpu.matmul %0, %1, %cst {dimension_numbers = #tpu.dot_dimension_numbers<[1], [0], [0], [1], [0, 0, 1, 1], [], []>} : vector<16x16xf32>, vector<16x16xf32>, vector<16x16xf32> -> vector<16x16xf32>
    %c0_3 = arith.constant 0 : index
    %c0_4 = arith.constant 0 : index
    %3 = vector.load %arg2[%c0_3, %c0_4] : memref<1x16xf32, #tpu.memory_space<vmem>>, vector<1x16xf32>
    %cst_5 = arith.constant 0.0166666675 : f32
    %4 = vector.broadcast %cst_5 : f32 to vector<1x16xf32>
    %5 = arith.mulf %3, %4 : vector<1x16xf32>
    %c0_6 = arith.constant 0 : index
    %c0_7 = arith.constant 0 : index
    %6 = vector.load %arg3[%c0_6, %c0_7] : memref<1x16xf32, #tpu.memory_space<vmem>>, vector<1x16xf32>
    %cst_8 = arith.constant 0.0166666675 : f32
    %7 = vector.broadcast %cst_8 : f32 to vector<1x16xf32>
    %8 = arith.mulf %6, %7 : vector<1x16xf32>
    %9 = arith.mulf %5, %5 : vector<1x16xf32>
    %10 = arith.subf %8, %9 : vector<1x16xf32>
    %cst_9 = arith.constant 0.000000e+00 : f32
    %11 = vector.broadcast %cst_9 : f32 to vector<1x16xf32>
    %12 = arith.maximumf %10, %11 : vector<1x16xf32>
    %cst_10 = arith.constant 9.99999974E-6 : f32
    %13 = vector.broadcast %cst_10 : f32 to vector<1x16xf32>
    %14 = arith.addf %12, %13 : vector<1x16xf32>
    %15 = math.rsqrt %14 : vector<1x16xf32>
    %c0_11 = arith.constant 0 : index
    %c0_12 = arith.constant 0 : index
    %16 = vector.load %arg5[%c0_11, %c0_12] : memref<1x16xf32, #tpu.memory_space<vmem>>, vector<1x16xf32>
    %17 = arith.mulf %15, %16 : vector<1x16xf32>
    %18 = vector.broadcast %5 : vector<1x16xf32> to vector<16x16xf32>
    %19 = arith.subf %2, %18 : vector<16x16xf32>
    %20 = vector.broadcast %17 : vector<1x16xf32> to vector<16x16xf32>
    %21 = arith.mulf %19, %20 : vector<16x16xf32>
    %c0_13 = arith.constant 0 : index
    %c0_14 = arith.constant 0 : index
    %22 = vector.load %arg6[%c0_13, %c0_14] : memref<1x16xf32, #tpu.memory_space<vmem>>, vector<1x16xf32>
    %23 = vector.broadcast %22 : vector<1x16xf32> to vector<16x16xf32>
    %24 = arith.addf %21, %23 : vector<16x16xf32>
    %25 = arith.negf %24 : vector<16x16xf32>
    %26 = math.exp %25 : vector<16x16xf32>
    %cst_15 = arith.constant 1.000000e+00 : f32
    %27 = vector.broadcast %cst_15 : f32 to vector<16x16xf32>
    %28 = arith.addf %27, %26 : vector<16x16xf32>
    %29 = arith.divf %27, %28 : vector<16x16xf32>
    %cst_16 = arith.constant 1.000000e+00 : f32
    %30 = vector.broadcast %cst_16 : f32 to vector<16x16xf32>
    %31 = arith.addf %30, %29 : vector<16x16xf32>
    %32 = arith.mulf %0, %31 : vector<16x16xf32>
    %c0_17 = arith.constant 0 : index
    %c0_18 = arith.constant 0 : index
    %33 = vector.load %arg7[%c0_17, %c0_18] : memref<16x16xf32, #tpu.memory_space<vmem>>, vector<16x16xf32>
    tpu.vector_store %arg7[%c0_17, %c0_18], %32 {strides = array<i32>} : memref<16x16xf32, #tpu.memory_space<vmem>>, vector<16x16xf32>,
    return
  }
  func.func @transform_0(%arg0: i32) -> (i32, i32) {
    %c0_i32 = arith.constant 0 : i32
    %c0_i32_0 = arith.constant 0 : i32
    return %arg0, %c0_i32 : i32, i32
  }
  func.func @transform_1(%arg0: i32) -> (i32, i32) {
    %c0_i32 = arith.constant 0 : i32
    %c0_i32_0 = arith.constant 0 : i32
    %c0_i32_1 = arith.constant 0 : i32
    return %c0_i32, %c0_i32_0 : i32, i32
  }
  func.func @transform_2(%arg0: i32) -> (i32, i32) {
    %c0_i32 = arith.constant 0 : i32
    %c0_i32_0 = arith.constant 0 : i32
    %c0_i32_1 = arith.constant 0 : i32
    return %c0_i32, %c0_i32_0 : i32, i32
  }
  func.func @transform_3(%arg0: i32) -> (i32, i32) {
    %c0_i32 = arith.constant 0 : i32
    %c0_i32_0 = arith.constant 0 : i32
    %c0_i32_1 = arith.constant 0 : i32
    return %c0_i32, %c0_i32_0 : i32, i32
  }
  func.func @transform_4(%arg0: i32) -> (i32, i32) {
    %c0_i32 = arith.constant 0 : i32
    %c0_i32_0 = arith.constant 0 : i32
    %c0_i32_1 = arith.constant 0 : i32
    return %c0_i32, %c0_i32_0 : i32, i32
  }
  func.func @transform_5(%arg0: i32) -> (i32, i32) {
    %c0_i32 = arith.constant 0 : i32
    %c0_i32_0 = arith.constant 0 : i32
    %c0_i32_1 = arith.constant 0 : i32
    return %c0_i32, %c0_i32_0 : i32, i32
  }
  func.func @transform_6(%arg0: i32) -> (i32, i32) {
    %c0_i32 = arith.constant 0 : i32
    %c0_i32_0 = arith.constant 0 : i32
    return %arg0, %c0_i32 : i32, i32
  }
}

</mosaic_0001>

<bundles_post_ra>
// kernel: custom-call
= control target key start
LH: loop header
LB: loop body
LE: loop exit
PB: predicated region body
PF: predicated region fallthrough
CT: control target
= control target key end

     0   :  { %s6_s0 = inlined_call_operand.vmem [shape: u32[1620], index: 0, kind: output, shape index: {}]  }

// kernel: attention_block.5
= control target key start
LH: loop header
LB: loop body
LE: loop exit
PB: predicated region body
PF: predicated region fallthrough
CT: control target
= control target key end

     0   :  { %s543_s21 = smov 0   ;;  %s589_s0 = inlined_call_operand.vmem [shape: f32[64,16], index: 0, kind: input, shape index: {}, may-alias: {0,6}]   ;;  %s590_s1 = inlined_call_operand.vmem [shape: f32[1,16], index: 1, kind: input, shape index: {}]   ;;  %s591_s2 = inlined_call_operand.vmem [shape: f32[1,16], index: 2, kind: input, shape index: {}]   ;;  %s592_s3 = inlined_call_operand.vmem [shape: f32[16,16], index: 3, kind: input, shape index: {}]   ;;  %s593_s4 = inlined_call_operand.vmem [shape: f32[1,16], index: 4, kind: input, shape index: {}]   ;;  %s594_s5 = inlined_call_operand.vmem [shape: f32[1,16], index: 5, kind: input, shape index: {}]   ;;  %s595_s6 = inlined_call_operand.vmem [shape: f32[64,16], index: 6, kind: output, shape index: {}, may-alias: {0,6}]  }
   0x1 LB: > { %s451_s22 = sadd.s32 4294967295, %s506_s21   ;;  %p455_p0 = scmp.ge.s32.totalorder %s506_s21, 1  ;;  %s506_s21 = sphi %s543_s21, %s16_s21  }
   0x2   : > { %p213_p1 = scmp.lt.s32.totalorder %s506_s21, 5 }
   0x4   : > { %p214_p2 = pnand %p455_p0, %p213_p1 }
   0x5   : > { %v257_v0 = vld [vmem:[%s592_s3] sm:$0xff] (!%p214_p2)  ;;  %v258_v1 = vld [vmem:[%s592_s3 + $0x8] sm:$0xff] (!%p214_p2)  ;;  %s456_s27 = sshll.u32 (!%p214_p2), %s451_s22, 1  ;;  %vm259_vm0 = vcmask (!%p214_p2), 130048   ;;  %v353_v13 = vlaneseq (!%p214_p2) }
   0x6   : > { %217 = sbr.rel (%p214_p2) target bundleno = 268 (0x10c), region = 44  ;;  %v478_v2 = vpack.c.bf16 (!%p214_p2), %v258_v1, %v257_v0  ;;  %p244_p3 = scmp.lt.s32.totalorder (!%p214_p2), %s456_s27, 7  ;;  %v341_v5 = vld [vmem:[%s590_s1] sm:$0x1] (!%p214_p2) }
   0x7   : > { %v342_v6 = vmul.f32 (!%p214_p2), 0.016666668, %v341_v5  ;;  %v343_v7 = vld [vmem:[%s591_s2] sm:$0x1] (!%p214_p2)  ;;  %v354_v14 = vshrl.u32 (!%p214_p2), %v353_v13, 7 }
   0x8   : > { %479 = vmatprep.subr.bf16.mxu0 (!%p214_p2), %v478_v2  ;;  %v344_v8 = vmul.f32 (!%p214_p2), 0.016666668, %v343_v7  ;;  %v350_v16 = vld [vmem:[%s593_s4] sm:$0x1] (!%p214_p2) }
   0x9   : > { %481 = vmatpush3.bf16.msra.mxu0 (!%p214_p2), %v478_v2  ;;  %v345_v9 = vmul.f32 (!%p214_p2), %v342_v6, %v342_v6  ;;  %v355_v17 = vsub.s32 (!%p214_p2), 0, %v354_v14  ;;  %v462_v24 = vld [vmem:[%s594_s5] ss:$0 sm:$0xff] (!%p214_p2) }
   0xb   : > { %v346_v10 = vsub.f32 (!%p214_p2), %v344_v8, %v345_v9  ;;  %v356_v19 = vrot.slane (!%p214_p2), %v342_v6, %v355_v17 }
   0xd   : > { %s597_s27 = smov (!%p244_p3, %s456_s27), 7  ;;  %v347_v11 = vmax.f32 %v346_v10, 0.0 }
   0xe   : > { %s457_s28 = sshll.u32 %s597_s27, 3 }
   0xf   : > { %s247_s7 = scalar_lea.vmem %s589_s0, %s457_s28  ;;  %v348_v12 = vadd.f32 1e-05, %v347_v11  ;;  %s253_s18 = scalar_lea.vmem %s595_s6, %s457_s28 }
  0x10   : > { %v255_v3 = vld [vmem:[%s247_s7] sm:$0xff]  ;;  %v256_v4 = vld [vmem:[%s247_s7 + $0x8] sm:$0xff] }
  0x11   : > { %475 = vmatprep.mubr.msk.f32.mxu0 %vm259_vm0, %v255_v3  ;;  %490 = vrsqrt.f32 %v348_v12 }
  0x12   : > { %476 = vmatmul.mubr.msk.f32.vlgmr.msra.gmra.mrb[0].mxu0 %vm259_vm0, %v256_v4 }
  0x1b   : > { %v491_v15 = vpop.eup %490 }
  0x1c   : > { %v351_v18 = vmul.f32 %v491_v15, %v350_v16 }
  0x1e   : > { %v364_v20 = vrot.slane %v351_v18, %v355_v17 }
  0xe5   : > { %v477_v21 = vpop.f32.mrb[0].mxu0 }
  0xe6   : > { %v359_v22 = vsub.f32 %v477_v21, %v356_v19  ;;  %v332_v23 = vpop.f32.mrb[1].mxu0 }
  0xe7   : > { %v358_v25 = vsub.f32 %v332_v23, %v356_v19 }
  0xe8   : > { %v367_v26 = vmul.f32 %v364_v20, %v359_v22 }
  0xe9   : > { %v366_v27 = vmul.f32 %v364_v20, %v358_v25 }
  0xea   : > { %v376_v28 = vadd.f32 %v462_v24, %v367_v26 }
  0xeb   : > { %v375_v29 = vadd.f32 %v462_v24, %v366_v27 }
  0xec   : > { %v464_v30 = vmul.f32 -1.442695, %v376_v28 }
  0xed   : > { %v463_v31 = vmul.f32 -1.442695, %v375_v29 }
  0xee   : > { %492 = vpow2.f32 %v464_v30 }
  0xef   : > { %494 = vpow2.f32 %v463_v31 }
  0xf8   : > { %v493_v32 = vpop.eup %492 }
  0xf9   : > { %v495_v33 = vpop.eup %494  ;;  %v384_v34 = vadd.f32 1.0, %v493_v32 }
  0xfa   : > { %v383_v35 = vadd.f32 1.0, %v495_v33 }
  0xfb   : > { %496 = vrcp.f32 %v384_v34 }
  0xfc   : > { %498 = vrcp.f32 %v383_v35 }
 0x105   : > { %v497_v36 = vpop.eup %496 }
 0x106   : > { %v499_v37 = vpop.eup %498  ;;  %v390_v38 = vadd.f32 1.0, %v497_v36 }
 0x107   : > { %v389_v39 = vadd.f32 1.0, %v499_v37 }
 0x108   : > { %v392_v41 = vmul.f32 %v390_v38, %v256_v4 }
 0x109   : > { %v391_v40 = vmul.f32 %v389_v39, %v255_v3 }
 0x10a   : > { %394 = vst.msk [vmem:[%s253_s18 + $0x8] sm:$0xff] %vm259_vm0, %v392_v41 }
 0x10b   : > { %393 = vst.msk [vmem:[%s253_s18] sm:$0xff] %vm259_vm0, %v391_v40 }
 0x10c PF: > { %s16_s21 = sadd.s32 1, %s506_s21  }
 0x10d   : > { %p13_p4 = scmp.ge.s32.totalorder %s16_s21, 6  }
 0x10f   :  { %15 = sbr.rel (!%p13_p4) target bundleno = 1 (0x1), region = 74 }

// kernel: attention_block.3
= control target key start
LH: loop header
LB: loop body
LE: loop exit
PB: predicated region body
PF: predicated region fallthrough
CT: control target
= control target key end

     0   :  { %s776_s15 = smov 0   ;;  %s917_s0 = inlined_call_operand.vmem [shape: bf16[64,432], index: 0, kind: input, shape index: {}]   ;;  %s918_s1 = inlined_call_operand.vmem [shape: bf16[432,16], index: 1, kind: input, shape index: {}]   ;;  %s919_s2 = inlined_call_operand.vmem [shape: f32[64,16], index: 2, kind: output, shape index: {0}]   ;;  %s920_s3 = inlined_call_operand.vmem [shape: f32[1,16], index: 3, kind: output, shape index: {1}]   ;;  %s921_s4 = inlined_call_operand.vmem [shape: f32[1,16], index: 4, kind: output, shape index: {2}]  }
   0x1 LB: > { %s630_s16 = sadd.s32 4294967295, %s747_s15   ;;  %p634_p0 = scmp.ge.s32.totalorder %s747_s15, 1  ;;  %s747_s15 = sphi %s776_s15, %s15_s15  }
   0x2   : > { %p159_p1 = scmp.lt.s32.totalorder %s747_s15, 5 }
   0x4   : > { %p160_p2 = pnand %p634_p0, %p159_p1 }
   0x5   : > { %v708_v0 = vld [vmem:[%s918_s1 + $0x80] sm:$0xff] (!%p160_p2)   ;;  %v749_v1 = vmov (!%p160_p2), 0   ;;  %v709_v2 = vld [vmem:[%s918_s1 + $0x88] sm:$0xff] (!%p160_p2)   ;;  %v712_v5 = vld [vmem:[%s918_s1 + $0x90] sm:$0xff] (!%p160_p2)   ;;  %s635_s9 = sshll.u32 (!%p160_p2), %s630_s16, 1  ;;  %vm439_vm0 = vcmask (!%p160_p2), 392192  }
   0x6   : > { %163 = sbr.rel (%p160_p2) target bundleno = 287 (0x11f), region = 28  ;;  %484 = vmatprep.subr.bf16.mxu1 (!%p160_p2), %v749_v1  ;;  %v710_v3 = vld [vmem:[%s918_s1 + $0x40] sm:$0xff] (!%p160_p2)   ;;  %v713_v6 = vld [vmem:[%s918_s1 + $0x48] sm:$0xff] (!%p160_p2)   ;;  %v716_v8 = vld [vmem:[%s918_s1 + $0x50] sm:$0xff] (!%p160_p2)   ;;  %p187_p3 = scmp.lt.s32.totalorder (!%p160_p2), %s635_s9, 7  ;;  %vm525_vm1 = vcmask (!%p160_p2), 130048  }
   0x7   : > { %485 = vmatpush1.bf16.msra.mxu1 (!%p160_p2), %v708_v0  ;;  %v711_v4 = vld [vmem:[%s918_s1] sm:$0xff] (!%p160_p2)   ;;  %676 = vmatprep.subr.bf16.mxu0 (!%p160_p2), %v710_v3  ;;  %v714_v7 = vld [vmem:[%s918_s1 + $0x8] sm:$0xff] (!%p160_p2)   ;;  %v717_v9 = vld [vmem:[%s918_s1 + $0x10] sm:$0xff] (!%p160_p2)   ;;  %p672_p4 = scmp.ne.s32.totalorder (!%p160_p2), %s630_s16, 0 }
   0x8   : > { %486 = vmatprep.subr.bf16.mxu1 (!%p160_p2), %v749_v1  ;;  %677 = vmatpush3.bf16.msra.mxu0 (!%p160_p2), %v711_v4  ;;  %v715_v10 = vld [vmem:[%s918_s1 + $0x98] sm:$0xff] (!%p160_p2)   ;;  %v718_v12 = vld [vmem:[%s918_s1 + $0xa0] sm:$0xff] (!%p160_p2)   ;;  %v721_v15 = vld [vmem:[%s918_s1 + $0xa8] sm:$0xff] (!%p160_p2)  }
   0x9   : > { %678 = vmatprep.subr.bf16.mxu0 (!%p160_p2), %v713_v6  ;;  %v719_v11 = vld [vmem:[%s918_s1 + $0x58] sm:$0xff] (!%p160_p2)   ;;  %v722_v14 = vld [vmem:[%s918_s1 + $0x60] sm:$0xff] (!%p160_p2)   ;;  %v725_v17 = vld [vmem:[%s918_s1 + $0x68] sm:$0xff] (!%p160_p2)  }
   0xa   : > { %v720_v13 = vld [vmem:[%s918_s1 + $0x18] sm:$0xff] (!%p160_p2)   ;;  %v723_v16 = vld [vmem:[%s918_s1 + $0x20] sm:$0xff] (!%p160_p2)   ;;  %v724_v18 = vld [vmem:[%s918_s1 + $0xb0] sm:$0xff] (!%p160_p2)  }
   0xb   : > { %487 = vmatpush1.bf16.msra.mxu1 (!%p160_p2), %v709_v2  ;;  %v726_v19 = vld [vmem:[%s918_s1 + $0x28] sm:$0xff] (!%p160_p2)   ;;  %v728_v20 = vld [vmem:[%s918_s1 + $0x70] sm:$0xff] (!%p160_p2)   ;;  %v727_v21 = vld [vmem:[%s918_s1 + $0xb8] sm:$0xff] (!%p160_p2)  }
   0xc   : > { %488 = vmatprep.subr.bf16.mxu1 (!%p160_p2), %v749_v1  ;;  %679 = vmatpush3.bf16.msra.mxu0 (!%p160_p2), %v714_v7  ;;  %v729_v22 = vld [vmem:[%s918_s1 + $0x30] sm:$0xff] (!%p160_p2)   ;;  %v731_v23 = vld [vmem:[%s918_s1 + $0x78] sm:$0xff] (!%p160_p2)   ;;  %v730_v27 = vld [vmem:[%s918_s1 + $0xc0] sm:$0xff] (!%p160_p2)  }
   0xd   : > { %680 = vmatprep.subr.bf16.mxu0 %v716_v8  ;;  %s923_s9 = smov (!%p187_p3, %s635_s9), 7  ;;  %v732_v25 = vld [vmem:[%s918_s1 + $0x38] sm:$0xff]   ;;  %v736_v29 = vld [vmem:[%s918_s1 + $0xc8] sm:$0xff]   ;;  %v737_v30 = vld [vmem:[%s918_s1 + $0xd0] sm:$0xff]   ;;  %vm532_vm2 = vcmask (!%p672_p4), 122880   ;;  %v750_v44 = vmov (!%p672_p4), 0.0  }
   0xe   : > { %s675_s30 = sshll.u32 %s923_s9, 4  ;;  %s639_s29 = sshll.u32 %s923_s9, 3  ;;  %533 = vst.msk [vmem:[%s920_s3] sm:$0x1] (!%p672_p4), %vm532_vm2, %v750_v44  ;;  %534 = vst.msk [vmem:[%s921_s4] sm:$0x1] (!%p672_p4), %vm532_vm2, %v750_v44 }
   0xf   : > { %489 = vmatpush1.bf16.msra.mxu1 %v712_v5  ;;  %s191_s12 = scalar_lea.vmem %s917_s0, %s675_s30  ;;  %s197_s6 = scalar_lea.vmem %s919_s2, %s639_s29 }
  0x10   : > { %490 = vmatprep.subr.bf16.mxu1 %v749_v1  ;;  %681 = vmatpush3.bf16.msra.mxu0 %v717_v9  ;;  %v735_v24 = vld [vmem:[%s191_s12 + $0x4] ss:$16 sps:$4 sm:$0xff]   ;;  %v740_v26 = vld [vmem:[%s191_s12 + $0xc] ss:$16 sps:$4 sm:$0xff]   ;;  %v733_v28 = vld [vmem:[%s191_s12] ss:$16 sps:$4 sm:$0xff]  }
  0x11   : > { %682 = vmatprep.subr.bf16.mxu0 %v719_v11  ;;  %475 = vmatprep.mubr.bf16.mxu0 %v735_v24  ;;  %v738_v31 = vld [vmem:[%s191_s12 + $0x8] ss:$16 sps:$4 sm:$0xff]  }
  0x12   : > { %671 = vmatprep.mubr.msk.bf16.mxu1 %vm439_vm0, %v740_v26 }
  0x13   : > { %491 = vmatpush1.bf16.msra.mxu1 %v715_v10 }
  0x14   : > { %492 = vmatprep.subr.bf16.mxu1 %v749_v1  ;;  %683 = vmatpush3.bf16.msra.mxu0 %v720_v13 }
  0x15   : > { %684 = vmatprep.subr.bf16.mxu0 %v722_v14 }
  0x17   : > { %493 = vmatpush1.bf16.msra.mxu1 %v718_v12 }
  0x18   : > { %494 = vmatprep.subr.bf16.mxu1 %v749_v1  ;;  %685 = vmatpush3.bf16.msra.mxu0 %v723_v16 }
  0x19   : > { %686 = vmatprep.subr.bf16.mxu0 %v725_v17 }
  0x1b   : > { %495 = vmatpush1.bf16.msra.mxu1 %v721_v15 }
  0x1c   : > { %496 = vmatprep.subr.bf16.mxu1 %v749_v1  ;;  %687 = vmatpush3.bf16.msra.mxu0 %v726_v19 }
  0x1d   : > { %688 = vmatprep.subr.bf16.mxu0 %v728_v20 }
  0x1f   : > { %497 = vmatpush1.bf16.msra.mxu1 %v724_v18 }
  0x20   : > { %498 = vmatprep.subr.bf16.mxu1 %v749_v1  ;;  %689 = vmatpush3.bf16.msra.mxu0 %v729_v22 }
  0x21   : > { %690 = vmatprep.subr.bf16.mxu0 %v731_v23 }
  0x23   : > { %499 = vmatpush1.bf16.msra.mxu1 %v727_v21 }
  0x24   : > { %500 = vmatprep.subr.bf16.mxu1 %v749_v1  ;;  %691 = vmatpush3.bf16.msra.mxu0 %v732_v25 }
  0x27   : > { %501 = vmatpush1.bf16.msra.mxu1 %v730_v27  ;;  %476 = vmatmul.mubr.bf16.vlgmr.msra.gmra.mrb[0].mxu0 %v733_v28 }
  0x28   : > { %502 = vmatprep.subr.bf16.mxu1 %v749_v1 }
  0x2b   : > { %503 = vmatpush1.bf16.msra.mxu1 %v736_v29 }
  0x2c   : > { %504 = vmatprep.subr.bf16.mxu1 %v749_v1 }
  0x2f   : > { %505 = vmatpush1.bf16.msra.mxu1 %v737_v30 }
  0x32   : > { %517 = vmatmul.mubr.bf16.vlgmr.msra.gmra.mrb[0].mxu1 %v738_v31 }
  0xfa   : > { %v692_v32 = vpop.f32.mrb[0].mxu0 }
  0xfb   : > { %v693_v33 = vpop.f32.mrb[1].mxu0 }
  0xfc   : > { %v694_v34 = vadd.f32 %v693_v33, %v692_v32  ;;  %v695_v35 = vpop.f32.mrb[2].mxu0 }
  0xfd   : > { %v696_v36 = vpop.f32.mrb[3].mxu0 }
  0xfe   : > { %v697_v37 = vadd.f32 %v696_v36, %v695_v35 }
 0x104   : > { %531 = sbr.rel (%p672_p4) target bundleno = 267 (0x10b), region = 32 }
 0x105   : > { %v518_v38 = vpop.f32.mrb[0].mxu1 }
 0x106   : > { %v519_v39 = vadd.f32 %v694_v34, %v518_v38  ;;  %v520_v40 = vpop.f32.mrb[1].mxu1 }
 0x107   : > { %v521_v41 = vpop.f32.mrb[2].mxu1 }
 0x108   : > { %526 = vst.msk [vmem:[%s197_s6] sm:$0xff] %vm525_vm1, %v519_v39  ;;  %v522_v42 = vadd.f32 %v697_v37, %v521_v41  ;;  %v523_v43 = vpop.f32.mrb[3].mxu1 }
 0x10a   : > { %527 = vst.msk [vmem:[%s197_s6 + $0x8] sm:$0xff] %vm525_vm1, %v522_v42 }
 0x10b PF: > { %v536_v45 = vsel %vm525_vm1, %v519_v39, 0.0  ;;  %v537_v46 = vsel %vm525_vm1, %v522_v42, 0.0  ;;  %v549_v47 = vmul.f32 %v519_v39, %v519_v39  ;;  %v550_v49 = vmul.f32 %v522_v42, %v522_v42  ;;  %v535_v61 = vld [vmem:[%s920_s3] sm:$0x1] }
 0x10c   : > { %v538_v48 = vadd.f32 %v537_v46, %v536_v45  ;;  %vm546_vm3 = vcmask 122880   ;;  %v548_v2 = vld [vmem:[%s921_s4] sm:$0x1] }
 0x10d   : > { %v551_v50 = vsel %vm525_vm1, %v549_v47, 0.0  ;;  %v552_v52 = vsel %vm525_vm1, %v550_v49, 0.0 }
 0x10e   : > { %v539_v51 = vrot.slane %v538_v48, 4  ;;  %v553_v53 = vadd.f32 %v552_v52, %v551_v50 }
 0x110   : > { %v540_v54 = vadd.f32 %v539_v51, %v538_v48  ;;  %v554_v55 = vrot.slane %v553_v53, 4 }
 0x112   : > { %v541_v56 = vrot.slane %v540_v54, 2  ;;  %v555_v57 = vadd.f32 %v554_v55, %v553_v53 }
 0x114   : > { %v542_v58 = vadd.f32 %v541_v56, %v540_v54  ;;  %v556_v59 = vrot.slane %v555_v57, 2 }
 0x116   : > { %v543_v60 = vrot.slane %v542_v58, 1  ;;  %v557_v62 = vadd.f32 %v556_v59, %v555_v57 }
 0x118   : > { %v544_v63 = vadd.f32 %v543_v60, %v542_v58  ;;  %v558_v0 = vrot.slane %v557_v62, 1 }
 0x11a   : > { %v545_v1 = vadd.f32 %v544_v63, %v535_v61  ;;  %v559_v3 = vadd.f32 %v558_v0, %v557_v62 }
 0x11c   : > { %547 = vst.msk [vmem:[%s920_s3] sm:$0x1] %vm546_vm3, %v545_v1  ;;  %v560_v4 = vadd.f32 %v559_v3, %v548_v2 }
 0x11e   : > { %561 = vst.msk [vmem:[%s921_s4] sm:$0x1] %vm546_vm3, %v560_v4 }
 0x11f PF: > { %s15_s15 = sadd.s32 1, %s747_s15  }
 0x120   : > { %p12_p5 = scmp.ge.s32.totalorder %s15_s15, 6  }
 0x122   :  { %14 = sbr.rel (!%p12_p5) target bundleno = 1 (0x1), region = 78 }

// kernel: attention_block.4
= control target key start
LH: loop header
LB: loop body
LE: loop exit
PB: predicated region body
PF: predicated region fallthrough
CT: control target
= control target key end

     0   :  { %s721_s30 = smov 0   ;;  %s794_s0 = inlined_call_operand.vmem [shape: f32[64,16], index: 0, kind: input, shape index: {}, may-alias: {0,7}]   ;;  %s795_s1 = inlined_call_operand.vmem [shape: f32[64,16], index: 1, kind: input, shape index: {}]   ;;  %s796_s2 = inlined_call_operand.vmem [shape: f32[1,16], index: 2, kind: input, shape index: {}]   ;;  %s797_s3 = inlined_call_operand.vmem [shape: f32[1,16], index: 3, kind: input, shape index: {}]   ;;  %s798_s4 = inlined_call_operand.vmem [shape: f32[16,16], index: 4, kind: input, shape index: {}]   ;;  %s799_s5 = inlined_call_operand.vmem [shape: f32[1,16], index: 5, kind: input, shape index: {}]   ;;  %s800_s6 = inlined_call_operand.vmem [shape: f32[1,16], index: 6, kind: input, shape index: {}]   ;;  %s801_s7 = inlined_call_operand.vmem [shape: f32[64,16], index: 7, kind: output, shape index: {0}, may-alias: {0,7}]   ;;  %s802_s8 = inlined_call_operand.vmem [shape: f32[1,16], index: 8, kind: output, shape index: {1}]   ;;  %s803_s9 = inlined_call_operand.vmem [shape: f32[1,16], index: 9, kind: output, shape index: {2}]  }
   0x1 LB: > { %s609_s10 = sadd.s32 4294967295, %s668_s30   ;;  %p613_p0 = scmp.ge.s32.totalorder %s668_s30, 1  ;;  %s668_s30 = sphi %s721_s30, %s20_s30  }
   0x2   : > { %p294_p1 = scmp.lt.s32.totalorder %s668_s30, 5 }
   0x4   : > { %p295_p2 = pnand %p613_p0, %p294_p1 }
   0x5   : > { %v412_v0 = vld [vmem:[%s798_s4] sm:$0xff] (!%p295_p2)  ;;  %v413_v1 = vld [vmem:[%s798_s4 + $0x8] sm:$0xff] (!%p295_p2)  ;;  %s614_s19 = sshll.u32 (!%p295_p2), %s609_s10, 1  ;;  %v367_v9 = vlaneseq (!%p295_p2)  ;;  %vm409_vm0 = vcmask (!%p295_p2), 130048   ;;  %p625_p4 = scmp.ne.s32.totalorder (!%p295_p2), %s609_s10, 0 }
   0x6   : > { %298 = sbr.rel (%p295_p2) target bundleno = 300 (0x12c), region = 48  ;;  %v353_v2 = vld [vmem:[%s796_s2] sm:$0x1] (!%p295_p2)  ;;  %v639_v3 = vpack.c.bf16 (!%p295_p2), %v413_v1, %v412_v0  ;;  %p336_p3 = scmp.lt.s32.totalorder (!%p295_p2), %s614_s19, 7 }
   0x7   : > { %v354_v4 = vmul.f32 (!%p295_p2), 0.016666668, %v353_v2  ;;  %v355_v5 = vld [vmem:[%s797_s3] sm:$0x1] (!%p295_p2)  ;;  %v368_v12 = vshrl.u32 (!%p295_p2), %v367_v9, 7 }
   0x8   : > { %v356_v6 = vmul.f32 (!%p295_p2), 0.016666668, %v355_v5  ;;  %640 = vmatprep.subr.bf16.mxu0 (!%p295_p2), %v639_v3  ;;  %v362_v15 = vld [vmem:[%s799_s5] sm:$0x1] (!%p295_p2) }
   0x9   : > { %v357_v7 = vmul.f32 (!%p295_p2), %v354_v4, %v354_v4  ;;  %642 = vmatpush3.bf16.msra.mxu0 (!%p295_p2), %v639_v3  ;;  %v369_v13 = vsub.s32 (!%p295_p2), 0, %v368_v12  ;;  %v620_v23 = vld [vmem:[%s800_s6] ss:$0 sm:$0xff] (!%p295_p2) }
   0xb   : > { %v358_v8 = vsub.f32 (!%p295_p2), %v356_v6, %v357_v7  ;;  %v370_v14 = vrot.slane (!%p295_p2), %v354_v4, %v369_v13 }
   0xd   : > { %v359_v10 = vmax.f32 %v358_v8, 0.0  ;;  %s805_s19 = smov (!%p336_p3, %s614_s19), 7  ;;  %vm499_vm1 = vcmask (!%p625_p4), 122880   ;;  %v670_v44 = vmov (!%p625_p4), 0.0  }
   0xe   : > { %s743_s20 = sshll.u32 %s805_s19, 3  ;;  %500 = vst.msk [vmem:[%s802_s8] sm:$0x1] (!%p625_p4), %vm499_vm1, %v670_v44  ;;  %501 = vst.msk [vmem:[%s803_s9] sm:$0x1] (!%p625_p4), %vm499_vm1, %v670_v44 }
   0xf   : > { %v360_v11 = vadd.f32 1e-05, %v359_v10  ;;  %s345_s23 = scalar_lea.vmem %s795_s1, %s743_s20  ;;  %s339_s11 = scalar_lea.vmem %s794_s0, %s743_s20 }
  0x10   : > { %v364_v16 = vld [vmem:[%s345_s23] sm:$0xff]  ;;  %v365_v17 = vld [vmem:[%s345_s23 + $0x8] sm:$0xff]  ;;  %s351_s14 = scalar_lea.vmem %s801_s7, %s743_s20 }
  0x11   : > { %652 = vrsqrt.f32 %v360_v11  ;;  %v372_v20 = vsub.f32 %v364_v16, %v370_v14  ;;  %v373_v21 = vsub.f32 %v365_v17, %v370_v14  ;;  %v403_v35 = vld [vmem:[%s339_s11] sm:$0xff]  ;;  %v404_v37 = vld [vmem:[%s339_s11 + $0x8] sm:$0xff] }
  0x1b   : > { %v653_v18 = vpop.eup %652 }
  0x1c   : > { %v363_v19 = vmul.f32 %v653_v18, %v362_v15 }
  0x1e   : > { %v378_v22 = vrot.slane %v363_v19, %v369_v13 }
  0x20   : > { %v380_v24 = vmul.f32 %v378_v22, %v372_v20  ;;  %v381_v25 = vmul.f32 %v378_v22, %v373_v21 }
  0x22   : > { %v389_v26 = vadd.f32 %v620_v23, %v380_v24  ;;  %v390_v27 = vadd.f32 %v620_v23, %v381_v25 }
  0x24   : > { %v621_v28 = vmul.f32 -1.442695, %v389_v26  ;;  %v622_v29 = vmul.f32 -1.442695, %v390_v27 }
  0x26   : > { %654 = vpow2.f32 %v621_v28 }
  0x27   : > { %656 = vpow2.f32 %v622_v29 }
  0x30   : > { %v655_v30 = vpop.eup %654 }
  0x31   : > { %v657_v31 = vpop.eup %656  ;;  %v397_v32 = vadd.f32 1.0, %v655_v30 }
  0x32   : > { %v398_v33 = vadd.f32 1.0, %v657_v31 }
  0x33   : > { %658 = vrcp.f32 %v397_v32 }
  0x34   : > { %660 = vrcp.f32 %v398_v33 }
  0x3d   : > { %v659_v34 = vpop.eup %658 }
  0x3e   : > { %v661_v36 = vpop.eup %660  ;;  %v405_v38 = vadd.f32 1.0, %v659_v34 }
  0x3f   : > { %v406_v39 = vadd.f32 1.0, %v661_v36 }
  0x40   : > { %v407_v40 = vmul.f32 %v405_v38, %v403_v35 }
  0x41   : > { %v408_v41 = vmul.f32 %v406_v39, %v404_v37 }
  0x42   : > { %410 = vst.msk [vmem:[%s351_s14] sm:$0xff] %vm409_vm0, %v407_v40  ;;  %636 = vmatprep.mubr.msk.f32.mxu0 %vm409_vm0, %v407_v40 }
  0x43   : > { %411 = vst.msk [vmem:[%s351_s14 + $0x8] sm:$0xff] %vm409_vm0, %v408_v41  ;;  %637 = vmatmul.mubr.msk.f32.vlgmr.msra.gmra.mrb[0].mxu0 %vm409_vm0, %v408_v41 }
 0x111   : > { %498 = sbr.rel (%p625_p4) target bundleno = 280 (0x118), region = 52 }
 0x116   : > { %v638_v42 = vpop.f32.mrb[0].mxu0 }
 0x117   : > { %v486_v43 = vpop.f32.mrb[1].mxu0 }
 0x118 PF: > { %v503_v45 = vsel %vm409_vm0, %v486_v43, 0.0  ;;  %v504_v46 = vsel %vm409_vm0, %v638_v42, 0.0  ;;  %v516_v47 = vmul.f32 %v486_v43, %v486_v43  ;;  %v517_v49 = vmul.f32 %v638_v42, %v638_v42  ;;  %v502_v61 = vld [vmem:[%s802_s8] sm:$0x1] }
 0x119   : > { %v505_v48 = vadd.f32 %v504_v46, %v503_v45  ;;  %vm513_vm2 = vcmask 122880   ;;  %v515_v2 = vld [vmem:[%s803_s9] sm:$0x1] }
 0x11a   : > { %v518_v50 = vsel %vm409_vm0, %v516_v47, 0.0  ;;  %v519_v52 = vsel %vm409_vm0, %v517_v49, 0.0 }
 0x11b   : > { %v506_v51 = vrot.slane %v505_v48, 4  ;;  %v520_v53 = vadd.f32 %v519_v52, %v518_v50 }
 0x11d   : > { %v507_v54 = vadd.f32 %v506_v51, %v505_v48  ;;  %v521_v55 = vrot.slane %v520_v53, 4 }
 0x11f   : > { %v508_v56 = vrot.slane %v507_v54, 2  ;;  %v522_v57 = vadd.f32 %v521_v55, %v520_v53 }
 0x121   : > { %v509_v58 = vadd.f32 %v508_v56, %v507_v54  ;;  %v523_v59 = vrot.slane %v522_v57, 2 }
 0x123   : > { %v510_v60 = vrot.slane %v509_v58, 1  ;;  %v524_v62 = vadd.f32 %v523_v59, %v522_v57 }
 0x125   : > { %v511_v63 = vadd.f32 %v510_v60, %v509_v58  ;;  %v525_v0 = vrot.slane %v524_v62, 1 }
 0x127   : > { %v512_v1 = vadd.f32 %v511_v63, %v502_v61  ;;  %v526_v3 = vadd.f32 %v525_v0, %v524_v62 }
 0x129   : > { %514 = vst.msk [vmem:[%s802_s8] sm:$0x1] %vm513_vm2, %v512_v1  ;;  %v527_v4 = vadd.f32 %v526_v3, %v515_v2 }
 0x12b   : > { %528 = vst.msk [vmem:[%s803_s9] sm:$0x1] %vm513_vm2, %v527_v4 }
 0x12c PF: > { %s20_s30 = sadd.s32 1, %s668_s30  }
 0x12d   : > { %p17_p5 = scmp.ge.s32.totalorder %s20_s30, 6  }
 0x12f   :  { %19 = sbr.rel (!%p17_p5) target bundleno = 1 (0x1), region = 101 }

</bundles_post_ra>
